<compile_context>
chip_gen: v6e
topology: v6e:2x2x1
jax: 0.10.0
libtpu: 0.0.40
codegen_flags: <defaults>
</compile_context>

<pallas_src>
import functools

import jax
import jax.numpy as jnp
from jax.experimental import pallas as pl
from jax.experimental.pallas import tpu as pltpu


def _rel_pos_kernel(table_wide_ref, k_of_col_ref, out_ref, *, tile_q, max_rel):
    """One grid step: emit `tile_q` query rows of the (Lq_pad, Lk*U) output slab."""
    q0 = pl.program_id(0) * tile_q                    # first q row of this tile
    wide = out_ref.shape[1]                           # Lk * num_units (lane-dense)

    # Per-element (q, k) indices -- no integer div/mod in the kernel:
    #   q = tile offset + row iota;  k = precomputed per-column map.
    row = jax.lax.broadcasted_iota(jnp.int32, (tile_q, wide), 0)
    q_idx = row + q0                                  # (tile_q, wide)
    k_idx = k_of_col_ref[...]                         # (1, wide), broadcasts over rows

    dist = k_idx - q_idx
    final = jnp.clip(dist, -max_rel, 0) + max_rel     # in [0, max_rel] (clamp hi=0, as in source)

    # Gather as a short VPU select chain over the (max_rel + 1) reachable table
    # rows (tiny vocab -> cheaper than a <10%-utilized MXU one-hot matmul).
    out = jnp.zeros((tile_q, wide), jnp.float32)
    for i in range(max_rel + 1):
        row_i = table_wide_ref[pl.ds(i, 1), :]        # (1, wide) pre-tiled table row
        out = jnp.where(final == i, row_i, out)

    out_ref[...] = out.astype(out_ref.dtype)


def _choose_tile_q(length_q, wide_width, vmem_budget_bytes=20 * 1024 * 1024):
    """Rows per grid step: multiple of 8, sized against a conservative VMEM budget
    that fits the 32 MiB scoped default on v5e/v6e and v7x's smaller 64 MiB VMEM."""
    lq_pad = max(8, ((length_q + 7) // 8) * 8)
    # Per output row resident in VMEM: 2x double-buffered output block plus ~2
    # f32/int32 temporaries of the same width.
    bytes_per_row = 4 * wide_width * 4
    tile = vmem_budget_bytes // max(bytes_per_row, 1)
    tile = max(8, min(int(tile), 1024, lq_pad))
    return (tile // 8) * 8


def relative_position_forward(embeddings_table, length_q, length_k,
                              max_relative_position, *, tile_q=None):
    """Returns (length_q, length_k, num_units) embeddings (same dtype as the table)."""
    vocab, num_units = embeddings_table.shape
    assert vocab == 2 * max_relative_position + 1
    wide = length_k * num_units                       # lane-dense output width

    if tile_q is None:
        tile_q = _choose_tile_q(length_q, wide)
    tile_q = max(8, (int(tile_q) // 8) * 8)
    grid_q = pl.cdiv(length_q, tile_q)
    lq_pad = grid_q * tile_q                          # padded rows, sliced off below

    # Tiny wrapper-side precompute (O(max_rel * Lk * U), negligible vs. output):
    #   * only rows [0, max_rel] of the table are reachable (clamp upper bound is 0),
    #   * tile each reachable row across Lk so the in-kernel select is lane-dense,
    #   * per-column k index so the kernel never does an integer div/mod.
    low_table = embeddings_table[: max_relative_position + 1, :]
    table_wide = jnp.tile(low_table, (1, length_k))                        # (max_rel+1, wide)
    k_of_col = jnp.repeat(
        jnp.arange(length_k, dtype=jnp.int32), num_units)[None, :]         # (1, wide)

    kernel = functools.partial(
        _rel_pos_kernel, tile_q=tile_q, max_rel=max_relative_position)

    out_bytes = int(lq_pad) * int(wide) * jnp.dtype(embeddings_table.dtype).itemsize
    cost = pl.CostEstimate(
        flops=int(lq_pad) * int(wide) * (2 * max_relative_position + 6),
        transcendentals=0,
        bytes_accessed=out_bytes
        + int(table_wide.size) * table_wide.dtype.itemsize
        + int(k_of_col.size) * 4,
    )

    out_wide = pl.pallas_call(
        kernel,
        out_shape=jax.ShapeDtypeStruct((lq_pad, wide), embeddings_table.dtype),
        grid_spec=pltpu.PrefetchScalarGridSpec(
            num_scalar_prefetch=0,
            grid=(grid_q,),
            in_specs=[
                # Both inputs are tiny, whole-block, constant index_map -> fetched
                # once and kept VMEM-resident across all grid steps.
                pl.BlockSpec((max_relative_position + 1, wide), lambda i: (0, 0)),
                pl.BlockSpec((1, wide), lambda i: (0, 0)),
            ],
            out_specs=pl.BlockSpec((tile_q, wide), lambda i: (i, 0)),
        ),
        compiler_params=pltpu.CompilerParams(
            # Row tiles are independent -> shard across v7x's 2 TensorCores.
            dimension_semantics=("parallel",),
            vmem_limit_bytes=32 * 1024 * 1024,
        ),
        cost_estimate=cost,
    )(table_wide, k_of_col)

    return out_wide[:length_q].reshape(length_q, length_k, num_units)


def _xavier_uniform(key, shape, dtype=jnp.float32):
    # nn.init.xavier_uniform_ for a 2D tensor: fan_out = shape[0], fan_in = shape[1].
    fan_out, fan_in = shape
    bound = (6.0 / (fan_in + fan_out)) ** 0.5
    return jax.random.uniform(key, shape, dtype=dtype, minval=-bound, maxval=bound)


if __name__ == "__main__":
    num_units = 32
    max_relative_position = 4

    key = jax.random.PRNGKey(0)
    embeddings_table = _xavier_uniform(
        key, (2 * max_relative_position + 1, num_units))

    def reference(table, lq, lk, max_rel):
        rq = jnp.arange(lq)
        rk = jnp.arange(lk)
        dist = rk[None, :] - rq[:, None]
        final = jnp.clip(dist, -max_rel, 0) + max_rel   # same bounds as the PyTorch clamp
        return table[final]

    # (Lq, Lk, forced tile_q): exercise single-tile, a multi-step parallel grid,
    # and a ragged Lq that needs row padding + wrapper-side slice.
    cases = [(8, 8, None), (16, 8, 8), (10, 8, 8)]
    for lq, lk, tq in cases:
        out = relative_position_forward(
            embeddings_table, lq, lk, max_relative_position, tile_q=tq)
        out = jax.block_until_ready(out)
        ref = reference(embeddings_table, lq, lk, max_relative_position)
        assert out.shape == (lq, lk, num_units)
        assert jnp.allclose(out, ref, atol=1e-6), f"mismatch vs reference for Lq={lq}, Lk={lk}"

    print("KERNEL_OK")
</pallas_src>

<mosaic_0001>
module attributes {stable_mosaic.version = 11 : i64} {
  func.func @_rel_pos_kernel(%arg0: i32, %arg1: memref<5x256xf32, #tpu.memory_space<vmem>>, %arg2: memref<1x256xi32, #tpu.memory_space<vmem>>, %arg3: memref<8x256xf32, #tpu.memory_space<vmem>>) attributes {dimension_semantics = [#tpu.dimension_semantics<parallel>], iteration_bounds = array<i64: 1>, scalar_prefetch = 0 : i64, scratch_operands = 0 : i64, tpu.core_type = #tpu.core_type<tc>, window_params = [{pipeline_mode = #tpu.pipeline_mode<synchronous>, transform_indices = @transform_0, window_bounds = array<i64: 5, 256>}, {pipeline_mode = #tpu.pipeline_mode<synchronous>, transform_indices = @transform_1, window_bounds = array<i64: 1, 256>}, {transform_indices = @transform_2, window_bounds = array<i64: 8, 256>}]} {
    %c8_i32 = arith.constant 8 : i32
    %0 = arith.muli %arg0, %c8_i32 : i32
    %1 = tpu.iota {dimensions = array<i32: 0>} : vector<8x256xi32>
    %2 = vector.broadcast %0 : i32 to vector<8x256xi32>
    %3 = arith.addi %1, %2 : vector<8x256xi32>
    %c0 = arith.constant 0 : index
    %c0_0 = arith.constant 0 : index
    %4 = vector.load %arg2[%c0, %c0_0] : memref<1x256xi32, #tpu.memory_space<vmem>>, vector<1x256xi32>
    %5 = vector.broadcast %4 : vector<1x256xi32> to vector<8x256xi32>
    %6 = arith.subi %5, %3 : vector<8x256xi32>
    %c-4_i32 = arith.constant -4 : i32
    %c0_i32 = arith.constant 0 : i32
    %7 = vector.broadcast %c-4_i32 : i32 to vector<8x256xi32>
    %8 = arith.maxsi %7, %6 : vector<8x256xi32>
    %9 = vector.broadcast %c0_i32 : i32 to vector<8x256xi32>
    %10 = arith.minsi %9, %8 : vector<8x256xi32>
    %c4_i32 = arith.constant 4 : i32
    %11 = vector.broadcast %c4_i32 : i32 to vector<8x256xi32>
    %12 = arith.addi %10, %11 : vector<8x256xi32>
    %cst = arith.constant 0.000000e+00 : f32
    %13 = vector.broadcast %cst : f32 to vector<8x256xf32>
    %c0_1 = arith.constant 0 : index
    %c0_2 = arith.constant 0 : index
    %14 = vector.load %arg1[%c0_1, %c0_2] : memref<5x256xf32, #tpu.memory_space<vmem>>, vector<1x256xf32>
    %c0_i32_3 = arith.constant 0 : i32
    %15 = vector.broadcast %c0_i32_3 : i32 to vector<8x256xi32>
    %16 = arith.cmpi eq, %12, %15 : vector<8x256xi32>
    %17 = vector.shape_cast %14 : vector<1x256xf32> to vector<1x256xf32>
    %18 = vector.broadcast %17 : vector<1x256xf32> to vector<8x256xf32>
    %19 = arith.select %16, %18, %13 : vector<8x256xi1>, vector<8x256xf32>
    %c1 = arith.constant 1 : index
    %c0_4 = arith.constant 0 : index
    %20 = vector.load %arg1[%c1, %c0_4] : memref<5x256xf32, #tpu.memory_space<vmem>>, vector<1x256xf32>
    %c1_i32 = arith.constant 1 : i32
    %21 = vector.broadcast %c1_i32 : i32 to vector<8x256xi32>
    %22 = arith.cmpi eq, %12, %21 : vector<8x256xi32>
    %23 = vector.shape_cast %20 : vector<1x256xf32> to vector<1x256xf32>
    %24 = vector.broadcast %23 : vector<1x256xf32> to vector<8x256xf32>
    %25 = arith.select %22, %24, %19 : vector<8x256xi1>, vector<8x256xf32>
    %c2 = arith.constant 2 : index
    %c0_5 = arith.constant 0 : index
    %26 = vector.load %arg1[%c2, %c0_5] : memref<5x256xf32, #tpu.memory_space<vmem>>, vector<1x256xf32>
    %c2_i32 = arith.constant 2 : i32
    %27 = vector.broadcast %c2_i32 : i32 to vector<8x256xi32>
    %28 = arith.cmpi eq, %12, %27 : vector<8x256xi32>
    %29 = vector.shape_cast %26 : vector<1x256xf32> to vector<1x256xf32>
    %30 = vector.broadcast %29 : vector<1x256xf32> to vector<8x256xf32>
    %31 = arith.select %28, %30, %25 : vector<8x256xi1>, vector<8x256xf32>
    %c3 = arith.constant 3 : index
    %c0_6 = arith.constant 0 : index
    %32 = vector.load %arg1[%c3, %c0_6] : memref<5x256xf32, #tpu.memory_space<vmem>>, vector<1x256xf32>
    %c3_i32 = arith.constant 3 : i32
    %33 = vector.broadcast %c3_i32 : i32 to vector<8x256xi32>
    %34 = arith.cmpi eq, %12, %33 : vector<8x256xi32>
    %35 = vector.shape_cast %32 : vector<1x256xf32> to vector<1x256xf32>
    %36 = vector.broadcast %35 : vector<1x256xf32> to vector<8x256xf32>
    %37 = arith.select %34, %36, %31 : vector<8x256xi1>, vector<8x256xf32>
    %c4 = arith.constant 4 : index
    %c0_7 = arith.constant 0 : index
    %38 = vector.load %arg1[%c4, %c0_7] : memref<5x256xf32, #tpu.memory_space<vmem>>, vector<1x256xf32>
    %c4_i32_8 = arith.constant 4 : i32
    %39 = vector.broadcast %c4_i32_8 : i32 to vector<8x256xi32>
    %40 = arith.cmpi eq, %12, %39 : vector<8x256xi32>
    %41 = vector.shape_cast %38 : vector<1x256xf32> to vector<1x256xf32>
    %42 = vector.broadcast %41 : vector<1x256xf32> to vector<8x256xf32>
    %43 = arith.select %40, %42, %37 : vector<8x256xi1>, vector<8x256xf32>
    %c0_9 = arith.constant 0 : index
    %c0_10 = arith.constant 0 : index
    %44 = vector.load %arg3[%c0_9, %c0_10] : memref<8x256xf32, #tpu.memory_space<vmem>>, vector<8x256xf32>
    tpu.vector_store %arg3[%c0_9, %c0_10], %43 {strides = array<i32>} : memref<8x256xf32, #tpu.memory_space<vmem>>, vector<8x256xf32>,
    return
  }
  func.func @transform_0(%arg0: i32) -> (i32, i32) {
    %c0_i32 = arith.constant 0 : i32
    %c0_i32_0 = arith.constant 0 : i32
    %c0_i32_1 = arith.constant 0 : i32
    return %c0_i32, %c0_i32_0 : i32, i32
  }
  func.func @transform_1(%arg0: i32) -> (i32, i32) {
    %c0_i32 = arith.constant 0 : i32
    %c0_i32_0 = arith.constant 0 : i32
    %c0_i32_1 = arith.constant 0 : i32
    return %c0_i32, %c0_i32_0 : i32, i32
  }
  func.func @transform_2(%arg0: i32) -> (i32, i32) {
    %c0_i32 = arith.constant 0 : i32
    %c0_i32_0 = arith.constant 0 : i32
    return %arg0, %c0_i32 : i32, i32
  }
}

</mosaic_0001>

<bundles_post_ra>
// kernel: tpu_custom_call.1
= control target key start
LH: loop header
LB: loop body
LE: loop exit
PB: predicated region body
PF: predicated region fallthrough
CT: control target
= control target key end

     0   :  { %7 = vsyncpa [#allocation3], 0  ;;  %s260_s0 = inlined_call_operand.hbm [shape: f32[5,256], index: 0, kind: input, shape index: {}]   ;;  %s261_s1 = inlined_call_operand.hbm [shape: s32[1,256], index: 1, kind: input, shape index: {}]   ;;  %s262_s2 = inlined_call_operand.hbm [shape: f32[8,256], index: 2, kind: output, shape index: {}]  }
   0x1   :  { %8 = vsyncpa [#allocation6], 0 }
   0x2   :  { %9 = vsyncpa [#allocation4], 0  ;;  %s233_s9 = smov [#allocation2]   ;;  %s234_s11 = smov [#allocation5]  }
   0x3   :  { %s16_s10 = sshll.u32 %s233_s9, 4  ;;  %s26_s12 = sshll.u32 %s234_s11, 4  ;;  %s17_s10 = int_to_ptr.vmem [resolvable:$true] %s16_s10  ;;  %s27_s12 = int_to_ptr.vmem [resolvable:$true] %s26_s12 }
   0x4   :  { %s175_s13 = scalar_lea.vmem %s17_s10, 256  ;;  %p180_p1 = scmp.lt.s32.totalorder %s17_s10, %s17_s10 }
   0x5   :  { %p176_p0 = scmp.ne.s32.totalorder %s17_s10, %s175_s13  ;;  %p181_p2 = scmp.lt.s32.totalorder %s175_s13, %s175_s13 }
   0x7   :  { %p182_p3 = por %p181_p2, %p180_p1 }
   0x9   :  { %p183_p4 = pnand %p182_p3, %p176_p0 }
   0xb   :  { %186 = shalt.err (!%p183_p4)
}
   0xc   :  { %19 = dma.hbm_to_vmem [thread:$0]  %s260_s0, 256, %s17_s10, [#allocation3]  }
   0xd   :  { %s195_s16 = scalar_lea.vmem %s27_s12, 32  ;;  %p200_p6 = scmp.lt.s32.totalorder %s27_s12, %s27_s12 }
   0xe   :  { %p196_p5 = scmp.ne.s32.totalorder %s27_s12, %s195_s16  ;;  %p201_p7 = scmp.lt.s32.totalorder %s195_s16, %s195_s16 }
  0x10   :  { %p202_p8 = por %p201_p7, %p200_p6 }
  0x12   :  { %p203_p9 = pnand %p202_p8, %p196_p5 }
  0x14   :  { %206 = shalt.err (!%p203_p9)
}
  0x15   :  { %29 = dma.hbm_to_vmem [thread:$0]  %s261_s1, 32, %s27_s12, [#allocation6]  }
  0x16   :  { %227 = dma.done.wait [#allocation3], 256  }
  0x17   :  { %228 = vsyncadd [#allocation3], 4294967040 }
  0x18   :  { %229 = dma.done.wait [#allocation6], 32  }
  0x19   :  { %230 = vsyncadd [#allocation6], 4294967264  ;;  %v37_v0 = vlaneseq  ;;  %v41_v4 = vld [vmem:[#allocation5] sm:$0x3]  ;;  %s235_s0 = smov [#allocation7]  }
  0x1a   :  { %v62_v9 = vld [vmem:[#allocation2] ss:$8 sm:$0x3]  ;;  %v79_v10 = vld [vmem:[#allocation2 + $0x1] ss:$8 sm:$0x3] }
  0x1b   :  { %v38_v1 = vshrl.u32 %v37_v0, 7  ;;  %v96_v11 = vld [vmem:[#allocation2 + $0x2] ss:$8 sm:$0x3]  ;;  %s154_s1 = sshll.u32 %s235_s0, 4  ;;  %s155_s1 = int_to_ptr.vmem [resolvable:$true] %s154_s1 }
  0x1c   :  { %v113_v13 = vld [vmem:[#allocation2 + $0x3] ss:$8 sm:$0x3]  ;;  %v130_v16 = vld [vmem:[#allocation2 + $0x4] ss:$8 sm:$0x3]  ;;  %p212_p11 = scmp.lt.s32.totalorder %s155_s1, %s155_s1 }
  0x1d   :  { %v44_v2 = vsub.s32 0, %v38_v1  ;;  %v48_v3 = vsub.s32 1, %v38_v1  ;;  %s207_s19 = scalar_lea.vmem %s155_s1, 256 }
  0x1e   :  { %p208_p10 = scmp.ne.s32.totalorder %s155_s1, %s207_s19  ;;  %p213_p12 = scmp.lt.s32.totalorder %s207_s19, %s207_s19 }
  0x1f   :  { %v45_v5 = vrot.slane %v41_v4, %v44_v2  ;;  %v49_v6 = vrot.slane %v41_v4, %v48_v3  ;;  %v69_v15 = vrot.slane %v62_v9, %v44_v2  ;;  %v73_v17 = vrot.slane %v62_v9, %v48_v3 }
  0x20   :  { %v86_v19 = vrot.slane %v79_v10, %v44_v2  ;;  %v103_v20 = vrot.slane %v96_v11, %v44_v2  ;;  %v90_v24 = vrot.slane %v79_v10, %v48_v3  ;;  %v107_v25 = vrot.slane %v96_v11, %v48_v3  ;;  %p214_p13 = por %p213_p12, %p212_p11 }
  0x21   :  { %v50_v7 = vsub.s32 %v45_v5, %v38_v1  ;;  %v51_v8 = vsub.s32 %v49_v6, %v38_v1  ;;  %v120_v26 = vrot.slane %v113_v13, %v44_v2  ;;  %v137_v27 = vrot.slane %v130_v16, %v44_v2 }
  0x22   :  { %v124_v28 = vrot.slane %v113_v13, %v48_v3  ;;  %v141_v29 = vrot.slane %v130_v16, %v48_v3  ;;  %p215_p0 = pnand %p214_p13, %p208_p10 }
  0x23   :  { %vm52_vm0 = vcmp.gt.s32.totalorder %v50_v7, 4294967292  ;;  %vm54_vm1 = vcmp.gt.s32.totalorder %v51_v8, 4294967292 }
  0x24   :  { %v53_v12 = vsel %vm52_vm0, %v50_v7, 4294967292  ;;  %v55_v14 = vsel %vm54_vm1, %v51_v8, 4294967292 }
  0x25   :  { %vm56_vm2 = vcmp.lt.s32.totalorder %v53_v12, 0  ;;  %vm58_vm3 = vcmp.lt.s32.totalorder %v55_v14, 0 }
  0x26   :  { %v57_v18 = vsel %vm56_vm2, %v53_v12, 0  ;;  %v59_v21 = vsel %vm58_vm3, %v55_v14, 0 }
  0x27   :  { %v60_v22 = vadd.s32 4, %v57_v18  ;;  %v61_v23 = vadd.s32 4, %v59_v21 }
  0x29   :  { %vm63_vm4 = vcmp.eq.s32.totalorder %v60_v22, 0  ;;  %vm80_vm5 = vcmp.eq.s32.totalorder %v60_v22, 1  ;;  %vm97_vm6 = vcmp.eq.s32.totalorder %v60_v22, 2  ;;  %vm114_vm7 = vcmp.eq.s32.totalorder %v60_v22, 3 }
  0x2a   :  { %v76_v30 = vsel %vm63_vm4, %v69_v15, 0.0  ;;  %vm131_vm8 = vcmp.eq.s32.totalorder %v60_v22, 4  ;;  %vm64_vm9 = vcmp.eq.s32.totalorder %v61_v23, 0  ;;  %vm81_vm10 = vcmp.eq.s32.totalorder %v61_v23, 1 }
  0x2b   :  { %v93_v31 = vsel %vm80_vm5, %v86_v19, %v76_v30  ;;  %v77_v32 = vsel %vm64_vm9, %v73_v17, 0.0  ;;  %vm98_vm11 = vcmp.eq.s32.totalorder %v61_v23, 2  ;;  %vm115_vm12 = vcmp.eq.s32.totalorder %v61_v23, 3 }
  0x2c   :  { %v110_v33 = vsel %vm97_vm6, %v103_v20, %v93_v31  ;;  %v94_v34 = vsel %vm81_vm10, %v90_v24, %v77_v32  ;;  %vm132_vm13 = vcmp.eq.s32.totalorder %v61_v23, 4 }
  0x2d   :  { %v127_v35 = vsel %vm114_vm7, %v120_v26, %v110_v33  ;;  %v111_v36 = vsel %vm98_vm11, %v107_v25, %v94_v34 }
  0x2e   :  { %v144_v37 = vsel %vm131_vm8, %v137_v27, %v127_v35  ;;  %v128_v38 = vsel %vm115_vm12, %v124_v28, %v111_v36 }
  0x2f   :  { %146 = vst [vmem:[#allocation7] sm:$0xff] %v144_v37  ;;  %v145_v39 = vsel %vm132_vm13, %v141_v29, %v128_v38 }
  0x30   :  { %147 = vst [vmem:[#allocation7 + $0x8] sm:$0xff] %v145_v39 }
  0x31   :  { %218 = shalt.err (!%p215_p0)
}
  0x32   :  { %157 = dma.vmem_to_hbm [thread:$0]  %s155_s1, 256, %s262_s2, [#allocation4]  }
  0x33   :  { %231 = dma.done.wait [#allocation4], 256  }
  0x34   :  { %232 = vsyncadd [#allocation4], 4294967040 }
  0x35   :  { %161 = vsyncpa [#allocation3], 1 }
  0x36   :  { %162 = vsyncpa [#allocation6], 1 }
  0x37   :  { %163 = vsyncpa [#allocation4], 1 }

</bundles_post_ra>
